<compile_context>
chip_gen: v7x
topology: tpu7x:2x2x1
jax: 0.10.0
libtpu: 0.0.40
codegen_flags: <defaults>
</compile_context>

<pallas_src>
import functools

import jax
import jax.numpy as jnp
from jax.experimental import pallas as pl
from jax.experimental.pallas import tpu as pltpu


def _lstm1_kernel(x_ref,      # (S*B, I)   time-major, flattened input
                  wih_ref,    # (I, 4H)    LSTM input->gates weight (pre-transposed)
                  whh_ref,    # (H, 4H)    LSTM hidden->gates weight (pre-transposed)
                  b_ref,      # (1, 4H)    combined bias (b_ih + b_hh)
                  w1_ref,     # (H, 128)   fc_1 weight (pre-transposed)
                  b1_ref,     # (1, 128)   fc_1 bias
                  w2_ref,     # (128, CP)  fc weight (pre-transposed, lane-padded)
                  b2_ref,     # (1, CP)    fc bias (lane-padded)
                  out_ref,    # (B, CP)    padded logits
                  *, seq_len, batch):
    S, B = seq_len, batch
    H = whh_ref.shape[0]

    whh_t = whh_ref[...]                                   # (H, 4H)

    # Hoisted input projection for all timesteps + fused bias (off the
    # serial recurrence path).
    xz = (jnp.dot(x_ref[...], wih_ref[...],
                  preferred_element_type=jnp.float32)
          + b_ref[...])                                    # (S*B, 4H)

    h = jnp.zeros((B, H), jnp.float32)
    c = jnp.zeros((B, H), jnp.float32)

    # Fully unrolled recurrence (S is small and static).
    for t in range(S):
        z = xz[t * B:(t + 1) * B, :] + jnp.dot(
            h, whh_t, preferred_element_type=jnp.float32)  # (B, 4H)
        # Full-vreg EUP ops on the packed gate vector, then per-gate slices.
        sig = jax.nn.sigmoid(z)
        tnh = jnp.tanh(z)
        # PyTorch gate order: input, forget, cell(g), output
        i_g = sig[:, 0 * H:1 * H]
        f_g = sig[:, 1 * H:2 * H]
        g_g = tnh[:, 2 * H:3 * H]
        o_g = sig[:, 3 * H:4 * H]
        c = f_g * c + i_g * g_g
        h = o_g * jnp.tanh(c)

    # hn.view(-1, H) with num_layers == 1  ->  (B, H)
    out = jnp.maximum(h, 0.0)                              # relu
    # dropout(p=0.5): identity in eval/inference mode
    out = jnp.dot(out, w1_ref[...],
                  preferred_element_type=jnp.float32) + b1_ref[...]   # fc_1
    out = jnp.maximum(out, 0.0)                            # relu
    # dropout(p=0.5): identity in eval/inference mode
    out = jnp.dot(out, w2_ref[...],
                  preferred_element_type=jnp.float32) + b2_ref[...]   # fc (padded)
    out_ref[...] = out.astype(out_ref.dtype)


@functools.partial(jax.jit, static_argnames=("num_classes",))
def lstm1_forward(x, params, num_classes):
    """x: (B, S, I) batch-first, like the PyTorch module.  Returns (B, C)."""
    B, S, I = x.shape
    wih, whh, bih, bhh, w1, b1, w2, b2 = params

    # Time-major + flatten (S, B) so the kernel does one input-projection matmul.
    x_tm = jnp.transpose(x, (1, 0, 2)).reshape(S * B, I)

    # Pre-transpose all weights once in XLA; keep the 4H/128 dims lane-dense.
    wih_t = wih.T                                  # (I, 4H)
    whh_t = whh.T                                  # (H, 4H)
    w1_t = w1.T                                    # (H, 128)
    b_lstm = (bih + bhh).reshape(1, -1)            # (1, 4H)
    b1_2d = b1.reshape(1, -1)                      # (1, 128)

    # Pad the final projection to a lane-dense 128-wide output block.
    CP = ((num_classes + 127) // 128) * 128
    w2_t = jnp.pad(w2.T, ((0, 0), (0, CP - num_classes)))          # (128, CP)
    b2_p = jnp.pad(b2.reshape(1, -1), ((0, 0), (0, CP - num_classes)))  # (1, CP)

    kernel = functools.partial(_lstm1_kernel, seq_len=S, batch=B)
    vmem_spec = pl.BlockSpec(memory_space=pltpu.MemorySpace.VMEM)
    out_padded = pl.pallas_call(
        kernel,
        out_shape=jax.ShapeDtypeStruct((B, CP), jnp.float32),
        in_specs=[vmem_spec] * 8,
        out_specs=vmem_spec,
    )(x_tm, wih_t, whh_t, b_lstm, w1_t, b1_2d, w2_t, b2_p)
    return out_padded[:, :num_classes]


def init_params(key, input_size, hidden_size, num_classes):
    """Deterministic parameter init (PyTorch-style uniform ranges)."""
    ks = jax.random.split(key, 8)
    k_lstm = 1.0 / jnp.sqrt(hidden_size)
    k_fc1 = 1.0 / jnp.sqrt(hidden_size)
    k_fc2 = 1.0 / jnp.sqrt(128.0)
    u = lambda k, shp, lim: jax.random.uniform(k, shp, jnp.float32, -lim, lim)
    wih = u(ks[0], (4 * hidden_size, input_size), k_lstm)
    whh = u(ks[1], (4 * hidden_size, hidden_size), k_lstm)
    bih = u(ks[2], (4 * hidden_size,), k_lstm)
    bhh = u(ks[3], (4 * hidden_size,), k_lstm)
    w1 = u(ks[4], (128, hidden_size), k_fc1)
    b1 = u(ks[5], (128,), k_fc1)
    w2 = u(ks[6], (num_classes, 128), k_fc2)
    b2 = u(ks[7], (num_classes,), k_fc2)
    return (wih, whh, bih, bhh, w1, b1, w2, b2)


if __name__ == "__main__":
    # Small shapes consistent with the module: batch=2, seq=8, input_size=4,
    # hidden_size=32, num_layers=1, num_classes=10.
    B, S, I, H, C = 2, 8, 4, 32, 10

    key = jax.random.PRNGKey(0)
    k_x, k_p = jax.random.split(key)
    x = jax.random.normal(k_x, (B, S, I), dtype=jnp.float32)
    params = init_params(k_p, I, H, C)

    out = lstm1_forward(x, params, C)
    out = jax.block_until_ready(out)
    assert out.shape == (B, C), out.shape
    assert jnp.all(jnp.isfinite(out))
    print("KERNEL_OK")
</pallas_src>

<mosaic_0001>
module attributes {stable_mosaic.version = 11 : i64} {
  func.func @_lstm1_kernel(%arg0: memref<16x4xf32, #tpu.memory_space<vmem>>, %arg1: memref<4x128xf32, #tpu.memory_space<vmem>>, %arg2: memref<32x128xf32, #tpu.memory_space<vmem>>, %arg3: memref<1x128xf32, #tpu.memory_space<vmem>>, %arg4: memref<32x128xf32, #tpu.memory_space<vmem>>, %arg5: memref<1x128xf32, #tpu.memory_space<vmem>>, %arg6: memref<128x128xf32, #tpu.memory_space<vmem>>, %arg7: memref<1x128xf32, #tpu.memory_space<vmem>>, %arg8: memref<2x128xf32, #tpu.memory_space<vmem>>) attributes {dimension_semantics = [], scalar_prefetch = 0 : i64, scratch_operands = 0 : i64, tpu.core_type = #tpu.core_type<tc>} {
    %c0 = arith.constant 0 : index
    %c0_0 = arith.constant 0 : index
    %0 = vector.load %arg2[%c0, %c0_0] : memref<32x128xf32, #tpu.memory_space<vmem>>, vector<32x128xf32>
    %c0_1 = arith.constant 0 : index
    %c0_2 = arith.constant 0 : index
    %1 = vector.load %arg0[%c0_1, %c0_2] : memref<16x4xf32, #tpu.memory_space<vmem>>, vector<16x4xf32>
    %c0_3 = arith.constant 0 : index
    %c0_4 = arith.constant 0 : index
    %2 = vector.load %arg1[%c0_3, %c0_4] : memref<4x128xf32, #tpu.memory_space<vmem>>, vector<4x128xf32>
    %cst = arith.constant dense<0.000000e+00> : vector<16x128xf32>
    %3 = tpu.matmul %1, %2, %cst {dimension_numbers = #tpu.dot_dimension_numbers<[1], [0], [0], [1], [0, 0, 1, 1], [], []>} : vector<16x4xf32>, vector<4x128xf32>, vector<16x128xf32> -> vector<16x128xf32>
    %c0_5 = arith.constant 0 : index
    %c0_6 = arith.constant 0 : index
    %4 = vector.load %arg3[%c0_5, %c0_6] : memref<1x128xf32, #tpu.memory_space<vmem>>, vector<1x128xf32>
    %5 = vector.broadcast %4 : vector<1x128xf32> to vector<16x128xf32>
    %6 = arith.addf %3, %5 : vector<16x128xf32>
    %cst_7 = arith.constant 0.000000e+00 : f32
    %7 = vector.broadcast %cst_7 : f32 to vector<2x32xf32>
    %cst_8 = arith.constant 0.000000e+00 : f32
    %8 = vector.broadcast %cst_8 : f32 to vector<2x32xf32>
    %9 = vector.extract_strided_slice %6 {offsets = [0, 0], sizes = [2, 128], strides = [1, 1]} : vector<16x128xf32> to vector<2x128xf32>
    %cst_9 = arith.constant dense<0.000000e+00> : vector<2x128xf32>
    %10 = tpu.matmul %7, %0, %cst_9 {dimension_numbers = #tpu.dot_dimension_numbers<[1], [0], [0], [1], [0, 0, 1, 1], [], []>} : vector<2x32xf32>, vector<32x128xf32>, vector<2x128xf32> -> vector<2x128xf32>
    %11 = arith.addf %9, %10 : vector<2x128xf32>
    %12 = arith.negf %11 : vector<2x128xf32>
    %13 = math.exp %12 : vector<2x128xf32>
    %cst_10 = arith.constant 1.000000e+00 : f32
    %14 = vector.broadcast %cst_10 : f32 to vector<2x128xf32>
    %15 = arith.addf %14, %13 : vector<2x128xf32>
    %16 = arith.divf %14, %15 : vector<2x128xf32>
    %17 = math.tanh %11 : vector<2x128xf32>
    %18 = vector.extract_strided_slice %16 {offsets = [0, 0], sizes = [2, 32], strides = [1, 1]} : vector<2x128xf32> to vector<2x32xf32>
    %19 = vector.extract_strided_slice %16 {offsets = [0, 32], sizes = [2, 32], strides = [1, 1]} : vector<2x128xf32> to vector<2x32xf32>
    %20 = vector.extract_strided_slice %17 {offsets = [0, 64], sizes = [2, 32], strides = [1, 1]} : vector<2x128xf32> to vector<2x32xf32>
    %21 = vector.extract_strided_slice %16 {offsets = [0, 96], sizes = [2, 32], strides = [1, 1]} : vector<2x128xf32> to vector<2x32xf32>
    %22 = arith.mulf %19, %8 : vector<2x32xf32>
    %23 = arith.mulf %18, %20 : vector<2x32xf32>
    %24 = arith.addf %22, %23 : vector<2x32xf32>
    %25 = math.tanh %24 : vector<2x32xf32>
    %26 = arith.mulf %21, %25 : vector<2x32xf32>
    %27 = vector.extract_strided_slice %6 {offsets = [2, 0], sizes = [2, 128], strides = [1, 1]} : vector<16x128xf32> to vector<2x128xf32>
    %cst_11 = arith.constant dense<0.000000e+00> : vector<2x128xf32>
    %28 = tpu.matmul %26, %0, %cst_11 {dimension_numbers = #tpu.dot_dimension_numbers<[1], [0], [0], [1], [0, 0, 1, 1], [], []>} : vector<2x32xf32>, vector<32x128xf32>, vector<2x128xf32> -> vector<2x128xf32>
    %29 = arith.addf %27, %28 : vector<2x128xf32>
    %30 = arith.negf %29 : vector<2x128xf32>
    %31 = math.exp %30 : vector<2x128xf32>
    %cst_12 = arith.constant 1.000000e+00 : f32
    %32 = vector.broadcast %cst_12 : f32 to vector<2x128xf32>
    %33 = arith.addf %32, %31 : vector<2x128xf32>
    %34 = arith.divf %32, %33 : vector<2x128xf32>
    %35 = math.tanh %29 : vector<2x128xf32>
    %36 = vector.extract_strided_slice %34 {offsets = [0, 0], sizes = [2, 32], strides = [1, 1]} : vector<2x128xf32> to vector<2x32xf32>
    %37 = vector.extract_strided_slice %34 {offsets = [0, 32], sizes = [2, 32], strides = [1, 1]} : vector<2x128xf32> to vector<2x32xf32>
    %38 = vector.extract_strided_slice %35 {offsets = [0, 64], sizes = [2, 32], strides = [1, 1]} : vector<2x128xf32> to vector<2x32xf32>
    %39 = vector.extract_strided_slice %34 {offsets = [0, 96], sizes = [2, 32], strides = [1, 1]} : vector<2x128xf32> to vector<2x32xf32>
    %40 = arith.mulf %37, %24 : vector<2x32xf32>
    %41 = arith.mulf %36, %38 : vector<2x32xf32>
    %42 = arith.addf %40, %41 : vector<2x32xf32>
    %43 = math.tanh %42 : vector<2x32xf32>
    %44 = arith.mulf %39, %43 : vector<2x32xf32>
    %45 = vector.extract_strided_slice %6 {offsets = [4, 0], sizes = [2, 128], strides = [1, 1]} : vector<16x128xf32> to vector<2x128xf32>
    %cst_13 = arith.constant dense<0.000000e+00> : vector<2x128xf32>
    %46 = tpu.matmul %44, %0, %cst_13 {dimension_numbers = #tpu.dot_dimension_numbers<[1], [0], [0], [1], [0, 0, 1, 1], [], []>} : vector<2x32xf32>, vector<32x128xf32>, vector<2x128xf32> -> vector<2x128xf32>
    %47 = arith.addf %45, %46 : vector<2x128xf32>
    %48 = arith.negf %47 : vector<2x128xf32>
    %49 = math.exp %48 : vector<2x128xf32>
    %cst_14 = arith.constant 1.000000e+00 : f32
    %50 = vector.broadcast %cst_14 : f32 to vector<2x128xf32>
    %51 = arith.addf %50, %49 : vector<2x128xf32>
    %52 = arith.divf %50, %51 : vector<2x128xf32>
    %53 = math.tanh %47 : vector<2x128xf32>
    %54 = vector.extract_strided_slice %52 {offsets = [0, 0], sizes = [2, 32], strides = [1, 1]} : vector<2x128xf32> to vector<2x32xf32>
    %55 = vector.extract_strided_slice %52 {offsets = [0, 32], sizes = [2, 32], strides = [1, 1]} : vector<2x128xf32> to vector<2x32xf32>
    %56 = vector.extract_strided_slice %53 {offsets = [0, 64], sizes = [2, 32], strides = [1, 1]} : vector<2x128xf32> to vector<2x32xf32>
    %57 = vector.extract_strided_slice %52 {offsets = [0, 96], sizes = [2, 32], strides = [1, 1]} : vector<2x128xf32> to vector<2x32xf32>
    %58 = arith.mulf %55, %42 : vector<2x32xf32>
    %59 = arith.mulf %54, %56 : vector<2x32xf32>
    %60 = arith.addf %58, %59 : vector<2x32xf32>
    %61 = math.tanh %60 : vector<2x32xf32>
    %62 = arith.mulf %57, %61 : vector<2x32xf32>
    %63 = vector.extract_strided_slice %6 {offsets = [6, 0], sizes = [2, 128], strides = [1, 1]} : vector<16x128xf32> to vector<2x128xf32>
    %cst_15 = arith.constant dense<0.000000e+00> : vector<2x128xf32>
    %64 = tpu.matmul %62, %0, %cst_15 {dimension_numbers = #tpu.dot_dimension_numbers<[1], [0], [0], [1], [0, 0, 1, 1], [], []>} : vector<2x32xf32>, vector<32x128xf32>, vector<2x128xf32> -> vector<2x128xf32>
    %65 = arith.addf %63, %64 : vector<2x128xf32>
    %66 = arith.negf %65 : vector<2x128xf32>
    %67 = math.exp %66 : vector<2x128xf32>
    %cst_16 = arith.constant 1.000000e+00 : f32
    %68 = vector.broadcast %cst_16 : f32 to vector<2x128xf32>
    %69 = arith.addf %68, %67 : vector<2x128xf32>
    %70 = arith.divf %68, %69 : vector<2x128xf32>
    %71 = math.tanh %65 : vector<2x128xf32>
    %72 = vector.extract_strided_slice %70 {offsets = [0, 0], sizes = [2, 32], strides = [1, 1]} : vector<2x128xf32> to vector<2x32xf32>
    %73 = vector.extract_strided_slice %70 {offsets = [0, 32], sizes = [2, 32], strides = [1, 1]} : vector<2x128xf32> to vector<2x32xf32>
    %74 = vector.extract_strided_slice %71 {offsets = [0, 64], sizes = [2, 32], strides = [1, 1]} : vector<2x128xf32> to vector<2x32xf32>
    %75 = vector.extract_strided_slice %70 {offsets = [0, 96], sizes = [2, 32], strides = [1, 1]} : vector<2x128xf32> to vector<2x32xf32>
    %76 = arith.mulf %73, %60 : vector<2x32xf32>
    %77 = arith.mulf %72, %74 : vector<2x32xf32>
    %78 = arith.addf %76, %77 : vector<2x32xf32>
    %79 = math.tanh %78 : vector<2x32xf32>
    %80 = arith.mulf %75, %79 : vector<2x32xf32>
    %81 = vector.extract_strided_slice %6 {offsets = [8, 0], sizes = [2, 128], strides = [1, 1]} : vector<16x128xf32> to vector<2x128xf32>
    %cst_17 = arith.constant dense<0.000000e+00> : vector<2x128xf32>
    %82 = tpu.matmul %80, %0, %cst_17 {dimension_numbers = #tpu.dot_dimension_numbers<[1], [0], [0], [1], [0, 0, 1, 1], [], []>} : vector<2x32xf32>, vector<32x128xf32>, vector<2x128xf32> -> vector<2x128xf32>
    %83 = arith.addf %81, %82 : vector<2x128xf32>
    %84 = arith.negf %83 : vector<2x128xf32>
    %85 = math.exp %84 : vector<2x128xf32>
    %cst_18 = arith.constant 1.000000e+00 : f32
    %86 = vector.broadcast %cst_18 : f32 to vector<2x128xf32>
    %87 = arith.addf %86, %85 : vector<2x128xf32>
    %88 = arith.divf %86, %87 : vector<2x128xf32>
    %89 = math.tanh %83 : vector<2x128xf32>
    %90 = vector.extract_strided_slice %88 {offsets = [0, 0], sizes = [2, 32], strides = [1, 1]} : vector<2x128xf32> to vector<2x32xf32>
    %91 = vector.extract_strided_slice %88 {offsets = [0, 32], sizes = [2, 32], strides = [1, 1]} : vector<2x128xf32> to vector<2x32xf32>
    %92 = vector.extract_strided_slice %89 {offsets = [0, 64], sizes = [2, 32], strides = [1, 1]} : vector<2x128xf32> to vector<2x32xf32>
    %93 = vector.extract_strided_slice %88 {offsets = [0, 96], sizes = [2, 32], strides = [1, 1]} : vector<2x128xf32> to vector<2x32xf32>
    %94 = arith.mulf %91, %78 : vector<2x32xf32>
    %95 = arith.mulf %90, %92 : vector<2x32xf32>
    %96 = arith.addf %94, %95 : vector<2x32xf32>
    %97 = math.tanh %96 : vector<2x32xf32>
    %98 = arith.mulf %93, %97 : vector<2x32xf32>
    %99 = vector.extract_strided_slice %6 {offsets = [10, 0], sizes = [2, 128], strides = [1, 1]} : vector<16x128xf32> to vector<2x128xf32>
    %cst_19 = arith.constant dense<0.000000e+00> : vector<2x128xf32>
    %100 = tpu.matmul %98, %0, %cst_19 {dimension_numbers = #tpu.dot_dimension_numbers<[1], [0], [0], [1], [0, 0, 1, 1], [], []>} : vector<2x32xf32>, vector<32x128xf32>, vector<2x128xf32> -> vector<2x128xf32>
    %101 = arith.addf %99, %100 : vector<2x128xf32>
    %102 = arith.negf %101 : vector<2x128xf32>
    %103 = math.exp %102 : vector<2x128xf32>
    %cst_20 = arith.constant 1.000000e+00 : f32
    %104 = vector.broadcast %cst_20 : f32 to vector<2x128xf32>
    %105 = arith.addf %104, %103 : vector<2x128xf32>
    %106 = arith.divf %104, %105 : vector<2x128xf32>
    %107 = math.tanh %101 : vector<2x128xf32>
    %108 = vector.extract_strided_slice %106 {offsets = [0, 0], sizes = [2, 32], strides = [1, 1]} : vector<2x128xf32> to vector<2x32xf32>
    %109 = vector.extract_strided_slice %106 {offsets = [0, 32], sizes = [2, 32], strides = [1, 1]} : vector<2x128xf32> to vector<2x32xf32>
    %110 = vector.extract_strided_slice %107 {offsets = [0, 64], sizes = [2, 32], strides = [1, 1]} : vector<2x128xf32> to vector<2x32xf32>
    %111 = vector.extract_strided_slice %106 {offsets = [0, 96], sizes = [2, 32], strides = [1, 1]} : vector<2x128xf32> to vector<2x32xf32>
    %112 = arith.mulf %109, %96 : vector<2x32xf32>
    %113 = arith.mulf %108, %110 : vector<2x32xf32>
    %114 = arith.addf %112, %113 : vector<2x32xf32>
    %115 = math.tanh %114 : vector<2x32xf32>
    %116 = arith.mulf %111, %115 : vector<2x32xf32>
    %117 = vector.extract_strided_slice %6 {offsets = [12, 0], sizes = [2, 128], strides = [1, 1]} : vector<16x128xf32> to vector<2x128xf32>
    %cst_21 = arith.constant dense<0.000000e+00> : vector<2x128xf32>
    %118 = tpu.matmul %116, %0, %cst_21 {dimension_numbers = #tpu.dot_dimension_numbers<[1], [0], [0], [1], [0, 0, 1, 1], [], []>} : vector<2x32xf32>, vector<32x128xf32>, vector<2x128xf32> -> vector<2x128xf32>
    %119 = arith.addf %117, %118 : vector<2x128xf32>
    %120 = arith.negf %119 : vector<2x128xf32>
    %121 = math.exp %120 : vector<2x128xf32>
    %cst_22 = arith.constant 1.000000e+00 : f32
    %122 = vector.broadcast %cst_22 : f32 to vector<2x128xf32>
    %123 = arith.addf %122, %121 : vector<2x128xf32>
    %124 = arith.divf %122, %123 : vector<2x128xf32>
    %125 = math.tanh %119 : vector<2x128xf32>
    %126 = vector.extract_strided_slice %124 {offsets = [0, 0], sizes = [2, 32], strides = [1, 1]} : vector<2x128xf32> to vector<2x32xf32>
    %127 = vector.extract_strided_slice %124 {offsets = [0, 32], sizes = [2, 32], strides = [1, 1]} : vector<2x128xf32> to vector<2x32xf32>
    %128 = vector.extract_strided_slice %125 {offsets = [0, 64], sizes = [2, 32], strides = [1, 1]} : vector<2x128xf32> to vector<2x32xf32>
    %129 = vector.extract_strided_slice %124 {offsets = [0, 96], sizes = [2, 32], strides = [1, 1]} : vector<2x128xf32> to vector<2x32xf32>
    %130 = arith.mulf %127, %114 : vector<2x32xf32>
    %131 = arith.mulf %126, %128 : vector<2x32xf32>
    %132 = arith.addf %130, %131 : vector<2x32xf32>
    %133 = math.tanh %132 : vector<2x32xf32>
    %134 = arith.mulf %129, %133 : vector<2x32xf32>
    %135 = vector.extract_strided_slice %6 {offsets = [14, 0], sizes = [2, 128], strides = [1, 1]} : vector<16x128xf32> to vector<2x128xf32>
    %cst_23 = arith.constant dense<0.000000e+00> : vector<2x128xf32>
    %136 = tpu.matmul %134, %0, %cst_23 {dimension_numbers = #tpu.dot_dimension_numbers<[1], [0], [0], [1], [0, 0, 1, 1], [], []>} : vector<2x32xf32>, vector<32x128xf32>, vector<2x128xf32> -> vector<2x128xf32>
    %137 = arith.addf %135, %136 : vector<2x128xf32>
    %138 = arith.negf %137 : vector<2x128xf32>
    %139 = math.exp %138 : vector<2x128xf32>
    %cst_24 = arith.constant 1.000000e+00 : f32
    %140 = vector.broadcast %cst_24 : f32 to vector<2x128xf32>
    %141 = arith.addf %140, %139 : vector<2x128xf32>
    %142 = arith.divf %140, %141 : vector<2x128xf32>
    %143 = math.tanh %137 : vector<2x128xf32>
    %144 = vector.extract_strided_slice %142 {offsets = [0, 0], sizes = [2, 32], strides = [1, 1]} : vector<2x128xf32> to vector<2x32xf32>
    %145 = vector.extract_strided_slice %142 {offsets = [0, 32], sizes = [2, 32], strides = [1, 1]} : vector<2x128xf32> to vector<2x32xf32>
    %146 = vector.extract_strided_slice %143 {offsets = [0, 64], sizes = [2, 32], strides = [1, 1]} : vector<2x128xf32> to vector<2x32xf32>
    %147 = vector.extract_strided_slice %142 {offsets = [0, 96], sizes = [2, 32], strides = [1, 1]} : vector<2x128xf32> to vector<2x32xf32>
    %148 = arith.mulf %145, %132 : vector<2x32xf32>
    %149 = arith.mulf %144, %146 : vector<2x32xf32>
    %150 = arith.addf %148, %149 : vector<2x32xf32>
    %151 = math.tanh %150 : vector<2x32xf32>
    %152 = arith.mulf %147, %151 : vector<2x32xf32>
    %cst_25 = arith.constant 0.000000e+00 : f32
    %153 = vector.broadcast %cst_25 : f32 to vector<2x32xf32>
    %154 = arith.maximumf %152, %153 : vector<2x32xf32>
    %c0_26 = arith.constant 0 : index
    %c0_27 = arith.constant 0 : index
    %155 = vector.load %arg4[%c0_26, %c0_27] : memref<32x128xf32, #tpu.memory_space<vmem>>, vector<32x128xf32>
    %cst_28 = arith.constant dense<0.000000e+00> : vector<2x128xf32>
    %156 = tpu.matmul %154, %155, %cst_28 {dimension_numbers = #tpu.dot_dimension_numbers<[1], [0], [0], [1], [0, 0, 1, 1], [], []>} : vector<2x32xf32>, vector<32x128xf32>, vector<2x128xf32> -> vector<2x128xf32>
    %c0_29 = arith.constant 0 : index
    %c0_30 = arith.constant 0 : index
    %157 = vector.load %arg5[%c0_29, %c0_30] : memref<1x128xf32, #tpu.memory_space<vmem>>, vector<1x128xf32>
    %158 = vector.broadcast %157 : vector<1x128xf32> to vector<2x128xf32>
    %159 = arith.addf %156, %158 : vector<2x128xf32>
    %cst_31 = arith.constant 0.000000e+00 : f32
    %160 = vector.broadcast %cst_31 : f32 to vector<2x128xf32>
    %161 = arith.maximumf %159, %160 : vector<2x128xf32>
    %c0_32 = arith.constant 0 : index
    %c0_33 = arith.constant 0 : index
    %162 = vector.load %arg6[%c0_32, %c0_33] : memref<128x128xf32, #tpu.memory_space<vmem>>, vector<128x128xf32>
    %cst_34 = arith.constant dense<0.000000e+00> : vector<2x128xf32>
    %163 = tpu.matmul %161, %162, %cst_34 {dimension_numbers = #tpu.dot_dimension_numbers<[1], [0], [0], [1], [0, 0, 1, 1], [], []>} : vector<2x128xf32>, vector<128x128xf32>, vector<2x128xf32> -> vector<2x128xf32>
    %c0_35 = arith.constant 0 : index
    %c0_36 = arith.constant 0 : index
    %164 = vector.load %arg7[%c0_35, %c0_36] : memref<1x128xf32, #tpu.memory_space<vmem>>, vector<1x128xf32>
    %165 = vector.broadcast %164 : vector<1x128xf32> to vector<2x128xf32>
    %166 = arith.addf %163, %165 : vector<2x128xf32>
    %c0_37 = arith.constant 0 : index
    %c0_38 = arith.constant 0 : index
    %167 = vector.load %arg8[%c0_37, %c0_38] : memref<2x128xf32, #tpu.memory_space<vmem>>, vector<2x128xf32>
    tpu.vector_store %arg8[%c0_37, %c0_38], %166 {strides = array<i32>} : memref<2x128xf32, #tpu.memory_space<vmem>>, vector<2x128xf32>,
    return
  }
}

</mosaic_0001>

<bundles_post_ra>
// kernel: lstm1_forward.1
= control target key start
LH: loop header
LB: loop body
LE: loop exit
PB: predicated region body
PF: predicated region fallthrough
CT: control target
= control target key end

     0   :  { %vm51_vm0 = vcmask 1043456   ;;  %vm44_vm1 = vcmask 31744   ;;  %v1568_v8 = vmov 0.0|0.0   ;;  %s1840_s0 = inlined_call_operand.vmem [shape: f32[16,4], index: 0, kind: input, shape index: {}]   ;;  %s1841_s1 = inlined_call_operand.vmem [shape: f32[4,128], index: 1, kind: input, shape index: {}]   ;;  %s1842_s2 = inlined_call_operand.vmem [shape: f32[32,128], index: 2, kind: input, shape index: {}]   ;;  %s1843_s3 = inlined_call_operand.vmem [shape: f32[1,128], index: 3, kind: input, shape index: {}]   ;;  %s1844_s4 = inlined_call_operand.vmem [shape: f32[32,128], index: 4, kind: input, shape index: {}]   ;;  %s1845_s5 = inlined_call_operand.vmem [shape: f32[1,128], index: 5, kind: input, shape index: {}]   ;;  %s1846_s6 = inlined_call_operand.vmem [shape: f32[128,128], index: 6, kind: input, shape index: {}]   ;;  %s1847_s7 = inlined_call_operand.vmem [shape: f32[1,128], index: 7, kind: input, shape index: {}]   ;;  %s1848_s8 = inlined_call_operand.hbm [shape: f32[2,128], index: 8, kind: output, shape index: {}]  }
   0x1   :  { %v36_v0 = vld [vmem:[%s1841_s1] sm:$0xf]  ;;  %v35_v2 = vld [vmem:[%s1840_s0 + $0x8] sm:$0xff]  ;;  %v32_v5 = vld [vmem:[%s1842_s2 + $0x10] sm:$0xff]  ;;  %1414 = vmatprep.subr.bf16.mxu0 %v1568_v8 }
   0x2   :  { %v34_v1 = vld [vmem:[%s1840_s0] sm:$0xff]  ;;  %1257 = vmatprep.subr.msk.mxu1 %vm51_vm0, %v36_v0  ;;  %v31_v4 = vld [vmem:[%s1842_s2 + $0x8] sm:$0xff]  ;;  %v33_v7 = vld [vmem:[%s1842_s2 + $0x18] sm:$0xff] }
   0x3   :  { %1259 = vmatprep.mubr.msk.f32.mxu1 %vm44_vm1, %v34_v1  ;;  %v30_v3 = vld [vmem:[%s1842_s2] sm:$0xff]  ;;  %1258 = vmatpush3.msk.msra.mxu1 %vm51_vm0, %v36_v0 }
   0x4   :  { %v1637_v6 = vpack.c.bf16 %v31_v4, %v30_v3 }
   0x5   :  { %13 = vsyncpa [#allocation3], 0  ;;  %1260 = vmatmul.mubr.msk.f32.vlgmr.msra.gmra.mrb[0].mxu1 %vm44_vm1, %v35_v2  ;;  %1396 = vmatprep.subr.bf16.mxu1 %v1568_v8  ;;  %v1645_v9 = vpack.c.bf16 %v33_v7, %v32_v5  ;;  %vm1569_vm2 = vmmov 0   ;;  %v1570_v10 = vmov 0.0   ;;  %v1170_v11 = vld [vmem:[%s1843_s3] ss:$0 sm:$0xff] }
   0x6   :  { %1398 = vmatpush3.bf16.msra.mxu1 %v1637_v6  ;;  %1270 = vmatprep.mubr.msk.f32.mxu1 %vm1569_vm2, %v1570_v10  ;;  %s1571_s18 = smov 64   ;;  %s1572_s3 = smov 32   ;;  %vm130_vm3 = vcmask 261120  }
   0x7   :  { %1399 = vmatprep.subr.bf16.mxu1 %v1568_v8  ;;  %1416 = vmatpush3.bf16.msra.mxu0 %v1637_v6  ;;  %s1573_s13 = smov [#allocation2]  }
   0x8   :  { %1417 = vmatprep.subr.bf16.mxu0 %v1568_v8  ;;  %1303 = vmatprep.mubr.msk.f32.mxu0 %vm1569_vm2, %v1570_v10  ;;  %s1162_s14 = sshll.u32 %s1573_s13, 4  ;;  %s1163_s14 = int_to_ptr.vmem [resolvable:$true] %s1162_s14 }
   0x9   :  { %p1549_p1 = scmp.lt.s32.totalorder %s1163_s14, %s1163_s14 }
   0xa   :  { %1401 = vmatpush3.bf16.msra.mxu1 %v1645_v9 }
   0xb   :  { %1402 = vmatprep.subr.bf16.mxu1 %v1568_v8  ;;  %1419 = vmatpush3.bf16.msra.mxu0 %v1645_v9 }
   0xc   :  { %1426 = vmatprep.subr.bf16.mxu0 %v1568_v8 }
   0xd   :  { %1271 = vmatmul.mubr.f32.vlgmr.msra.gmra.mrb[2].mxu1 %v1570_v10 }
   0xe   :  { %1404 = vmatpush3.bf16.msra.mxu1 %v1637_v6  ;;  %1281 = vmatprep.mubr.msk.f32.mxu1 %vm1569_vm2, %v1570_v10 }
   0xf   :  { %1405 = vmatprep.subr.bf16.mxu1 %v1568_v8 }
  0x12   :  { %1407 = vmatpush3.bf16.msra.mxu1 %v1645_v9 }
  0x13   :  { %1408 = vmatprep.subr.bf16.mxu1 %v1568_v8 }
  0xd8   :  { %v1261_v12 = vpop.f32.mrb[0].mxu1 }
  0xd9   :  { %v1668_v13 = vadd.f32 %v1261_v12, %v1170_v11  ;;  %v121_v14 = vpop.f32.mrb[1].mxu1 }
  0xda   :  { %v1670_v15 = vadd.f32 %v1170_v11, %v121_v14 }
  0xe0   :  { %v200_v16 = vpop.f32.mrb[2].mxu1 }
  0xe1   :  { %v204_v17 = vadd.f32 %v200_v16, %v1670_v15  ;;  %v1272_v18 = vpop.f32.mrb[3].mxu1 }
  0xe3   :  { %1480 = vtanh.f32 %v204_v17  ;;  %v1174_v20 = vmul.f32 -1.442695, %v204_v17 }
  0xe5   :  { %1482 = vpow2.f32 %v1174_v20 }
  0xed   :  { %v1481_v19 = vpop.eup %1480 }
  0xee   :  { %214 = vrot.lane.b32.xlu0 %v1481_v19, %s1571_s18 }
  0xef   :  { %v1483_v21 = vpop.eup %1482 }
  0xf0   :  { %v208_v22 = vadd.f32 1.0, %v1483_v21 }
  0xf2   :  { %1484 = vrcp.f32 %v208_v22 }
  0xfc   :  { %v1485_v23 = vpop.eup %1484 }
  0xfd   :  { %v212_v26 = vmul.f32 0.0, %v1485_v23 }
 0x160   :  { %v215_v24 = vpop.permute.xlu0 %214 }
 0x161   :  { %v217_v25 = vmul.f32 %v1485_v23, %v215_v24 }
 0x163   :  { %219 = vrot.lane.b32.xlu0 %v217_v25, %s1572_s3 }
 0x1d5   :  { %v220_v27 = vpop.permute.xlu0 %219 }
 0x1d6   :  { %v222_v28 = vadd.f32 %v220_v27, %v212_v26 }
 0x1d8   :  { %1486 = vtanh.f32 %v222_v28  ;;  %v316_v44 = vrot.slane %v222_v28, 6 }
 0x1e2   :  { %v1487_v29 = vpop.eup %1486 }
 0x1e3   :  { %225 = vrot.lane.b32.xlu1 %v1487_v29, %s1571_s18 }
 0x255   :  { %v226_v30 = vpop.permute.xlu1 %225 }
 0x256   :  { %v228_v31 = vmul.f32 %v1485_v23, %v226_v30 }
 0x258   :  { %230 = vrot.lane.b32.xlu1 %v228_v31, %s1572_s3 }
 0x2ca   :  { %v231_v32 = vpop.permute.xlu1 %230 }
 0x2cb   :  { %1282 = vmatmul.mubr.msk.f32.vlgmr.msra.gmra.mrb[4].mxu1 %vm130_vm3, %v231_v32 }
 0x2cc   :  { %1410 = vmatpush3.bf16.msra.mxu1 %v1637_v6  ;;  %1292 = vmatprep.mubr.msk.f32.mxu1 %vm1569_vm2, %v1570_v10 }
 0x2cd   :  { %1411 = vmatprep.subr.bf16.mxu1 %v1568_v8 }
 0x2d0   :  { %1413 = vmatpush3.bf16.msra.mxu1 %v1645_v9 }
 0x2d1   :  { %1420 = vmatprep.subr.bf16.mxu1 %v1568_v8 }
 0x39e   :  { %v300_v33 = vpop.f32.mrb[4].mxu1 }
 0x39f   :  { %v305_v34 = vrot.slane %v300_v33, 6  ;;  %v1283_v35 = vpop.f32.mrb[5].mxu1 }
 0x3a1   :  { %v307_v36 = vadd.f32 %v305_v34, %v1670_v15 }
 0x3a3   :  { %1488 = vtanh.f32 %v307_v36  ;;  %v1176_v38 = vmul.f32 -1.442695, %v307_v36 }
 0x3a5   :  { %1490 = vpow2.f32 %v1176_v38 }
 0x3ad   :  { %v1489_v37 = vpop.eup %1488 }
 0x3ae   :  { %320 = vrot.lane.b32.xlu0 %v1489_v37, %s1571_s18 }
 0x3af   :  { %v1491_v39 = vpop.eup %1490 }
 0x3b0   :  { %v311_v40 = vadd.f32 1.0, %v1491_v39 }
 0x3b2   :  { %1492 = vrcp.f32 %v311_v40 }
 0x3bc   :  { %v1493_v41 = vpop.eup %1492 }
 0x3bd   :  { %v318_v45 = vmul.f32 %v1493_v41, %v316_v44 }
 0x420   :  { %v321_v42 = vpop.permute.xlu0 %320 }
 0x421   :  { %v323_v43 = vmul.f32 %v1493_v41, %v321_v42 }
 0x423   :  { %325 = vrot.lane.b32.xlu1 %v323_v43, %s1572_s3 }
 0x495   :  { %v326_v46 = vpop.permute.xlu1 %325 }
 0x496   :  { %v328_v47 = vadd.f32 %v326_v46, %v318_v45 }
 0x498   :  { %1494 = vtanh.f32 %v328_v47  ;;  %v423_v0 = vrot.slane %v328_v47, 6 }
 0x4a2   :  { %v1495_v48 = vpop.eup %1494 }
 0x4a3   :  { %331 = vrot.lane.b32.xlu0 %v1495_v48, %s1571_s18 }
 0x515   :  { %v332_v49 = vpop.permute.xlu0 %331 }
 0x516   :  { %v334_v50 = vmul.f32 %v1493_v41, %v332_v49 }
 0x518   :  { %v336_v51 = vrot.slane %v334_v50, 2 }
 0x51a   :  { %337 = vrot.lane.b32.xlu1 %v336_v51, %s1572_s3 }
 0x58c   :  { %v338_v52 = vpop.permute.xlu1 %337 }
 0x58d   :  { %1293 = vmatmul.mubr.msk.f32.vlgmr.msra.gmra.mrb[6].mxu1 %vm130_vm3, %v338_v52 }
 0x58e   :  { %1422 = vmatpush3.bf16.msra.mxu1 %v1637_v6  ;;  %1314 = vmatprep.mubr.msk.f32.mxu1 %vm1569_vm2, %v1570_v10 }
 0x58f   :  { %1423 = vmatprep.subr.bf16.mxu1 %v1568_v8 }
 0x592   :  { %1425 = vmatpush3.bf16.msra.mxu1 %v1645_v9 }
 0x593   :  { %1432 = vmatprep.subr.bf16.mxu1 %v1568_v8 }
 0x660   :  { %v407_v53 = vpop.f32.mrb[6].mxu1 }
 0x661   :  { %v412_v54 = vrot.slane %v407_v53, 4  ;;  %v1294_v55 = vpop.f32.mrb[7].mxu1 }
 0x663   :  { %v414_v56 = vadd.f32 %v412_v54, %v1670_v15 }
 0x665   :  { %1496 = vtanh.f32 %v414_v56  ;;  %v1178_v58 = vmul.f32 -1.442695, %v414_v56 }
 0x667   :  { %1498 = vpow2.f32 %v1178_v58 }
 0x66f   :  { %v1497_v57 = vpop.eup %1496 }
 0x670   :  { %427 = vrot.lane.b32.xlu0 %v1497_v57, %s1571_s18 }
 0x671   :  { %v1499_v59 = vpop.eup %1498 }
 0x672   :  { %v418_v60 = vadd.f32 1.0, %v1499_v59 }
 0x674   :  { %1500 = vrcp.f32 %v418_v60 }
 0x67e   :  { %v1501_v61 = vpop.eup %1500 }
 0x67f   :  { %v425_v1 = vmul.f32 %v1501_v61, %v423_v0 }
 0x6e2   :  { %v428_v62 = vpop.permute.xlu0 %427 }
 0x6e3   :  { %v430_v63 = vmul.f32 %v1501_v61, %v428_v62 }
 0x6e5   :  { %432 = vrot.lane.b32.xlu1 %v430_v63, %s1572_s3 }
 0x757   :  { %v433_v2 = vpop.permute.xlu1 %432 }
 0x758   :  { %v435_v3 = vadd.f32 %v433_v2, %v425_v1 }
 0x75a   :  { %1502 = vtanh.f32 %v435_v3  ;;  %v530_v26 = vrot.slane %v435_v3, 6 }
 0x764   :  { %v1503_v4 = vpop.eup %1502 }
 0x765   :  { %438 = vrot.lane.b32.xlu0 %v1503_v4, %s1571_s18 }
 0x7d7   :  { %v439_v5 = vpop.permute.xlu0 %438 }
 0x7d8   :  { %v441_v7 = vmul.f32 %v1501_v61, %v439_v5 }
 0x7da   :  { %v443_v11 = vrot.slane %v441_v7, 4 }
 0x7dc   :  { %444 = vrot.lane.b32.xlu1 %v443_v11, %s1572_s3 }
 0x84e   :  { %v445_v12 = vpop.permute.xlu1 %444 }
 0x84f   :  { %1304 = vmatmul.mubr.msk.f32.vlgmr.msra.gmra.mrb[0].mxu0 %vm130_vm3, %v445_v12 }
 0x850   :  { %1428 = vmatpush3.bf16.msra.mxu0 %v1637_v6  ;;  %1325 = vmatprep.mubr.msk.f32.mxu0 %vm1569_vm2, %v1570_v10 }
 0x851   :  { %1429 = vmatprep.subr.bf16.mxu0 %v1568_v8 }
 0x854   :  { %1431 = vmatpush3.bf16.msra.mxu0 %v1645_v9 }
 0x855   :  { %1438 = vmatprep.subr.bf16.mxu0 %v1568_v8 }
 0x922   :  { %v514_v14 = vpop.f32.mrb[0].mxu0 }
 0x923   :  { %v519_v16 = vrot.slane %v514_v14, 2  ;;  %v1305_v17 = vpop.f32.mrb[1].mxu0 }
 0x925   :  { %v521_v18 = vadd.f32 %v519_v16, %v1670_v15 }
 0x927   :  { %1504 = vtanh.f32 %v521_v18  ;;  %v1180_v20 = vmul.f32 -1.442695, %v521_v18 }
 0x929   :  { %1506 = vpow2.f32 %v1180_v20 }
 0x931   :  { %v1505_v19 = vpop.eup %1504 }
 0x932   :  { %534 = vrot.lane.b32.xlu0 %v1505_v19, %s1571_s18 }
 0x933   :  { %v1507_v21 = vpop.eup %1506 }
 0x934   :  { %v525_v22 = vadd.f32 1.0, %v1507_v21 }
 0x936   :  { %1508 = vrcp.f32 %v525_v22 }
 0x940   :  { %v1509_v23 = vpop.eup %1508 }
 0x941   :  { %v532_v27 = vmul.f32 %v1509_v23, %v530_v26 }
 0x9a4   :  { %v535_v24 = vpop.permute.xlu0 %534 }
 0x9a5   :  { %v537_v25 = vmul.f32 %v1509_v23, %v535_v24 }
 0x9a7   :  { %539 = vrot.lane.b32.xlu1 %v537_v25, %s1572_s3 }
 0xa19   :  { %v540_v28 = vpop.permute.xlu1 %539 }
 0xa1a   :  { %v542_v29 = vadd.f32 %v540_v28, %v532_v27 }
 0xa1c   :  { %1510 = vtanh.f32 %v542_v29  ;;  %v634_v44 = vrot.slane %v542_v29, 6 }
 0xa26   :  { %v1511_v15 = vpop.eup %1510 }
 0xa27   :  { %545 = vrot.lane.b32.xlu0 %v1511_v15, %s1571_s18 }
 0xa99   :  { %v546_v30 = vpop.permute.xlu0 %545 }
 0xa9a   :  { %v548_v31 = vmul.f32 %v1509_v23, %v546_v30 }
 0xa9c   :  { %v550_v32 = vrot.slane %v548_v31, 6 }
 0xa9e   :  { %551 = vrot.lane.b32.xlu1 %v550_v32, %s1572_s3 }
 0xb10   :  { %v552_v33 = vpop.permute.xlu1 %551 }
 0xb11   :  { %1315 = vmatmul.mubr.msk.f32.vlgmr.msra.gmra.mrb[8].mxu1 %vm130_vm3, %v552_v33 }
 0xb12   :  { %1434 = vmatpush3.bf16.msra.mxu1 %v1637_v6  ;;  %1336 = vmatprep.mubr.msk.f32.mxu1 %vm1569_vm2, %v1570_v10 }
 0xb13   :  { %1435 = vmatprep.subr.bf16.mxu1 %v1568_v8 }
 0xb16   :  { %1437 = vmatpush3.bf16.msra.mxu1 %v1645_v9 }
 0xb17   :  { %1444 = vmatprep.subr.bf16.mxu1 %v1568_v8 }
 0xbe4   :  { %v621_v34 = vpop.f32.mrb[8].mxu1 }
 0xbe5   :  { %v625_v35 = vadd.f32 %v621_v34, %v1668_v13  ;;  %v1316_v36 = vpop.f32.mrb[9].mxu1 }
 0xbe7   :  { %1512 = vtanh.f32 %v625_v35  ;;  %v1182_v38 = vmul.f32 -1.442695, %v625_v35 }
 0xbe9   :  { %1514 = vpow2.f32 %v1182_v38 }
 0xbf1   :  { %v1513_v37 = vpop.eup %1512 }
 0xbf2   :  { %638 = vrot.lane.b32.xlu0 %v1513_v37, %s1571_s18 }
 0xbf3   :  { %v1515_v39 = vpop.eup %1514 }
 0xbf4   :  { %v629_v40 = vadd.f32 1.0, %v1515_v39 }
 0xbf6   :  { %1516 = vrcp.f32 %v629_v40 }
 0xc00   :  { %v1517_v41 = vpop.eup %1516 }
 0xc01   :  { %v636_v45 = vmul.f32 %v1517_v41, %v634_v44 }
 0xc64   :  { %v639_v42 = vpop.permute.xlu0 %638 }
 0xc65   :  { %v641_v43 = vmul.f32 %v1517_v41, %v639_v42 }
 0xc67   :  { %643 = vrot.lane.b32.xlu1 %v641_v43, %s1572_s3 }
 0xcd9   :  { %v644_v46 = vpop.permute.xlu1 %643 }
 0xcda   :  { %v646_v47 = vadd.f32 %v644_v46, %v636_v45  ;;  %v975_v45 = vld [vmem:[%s1844_s4 + $0x8] sm:$0xff]  ;;  %v976_v46 = vld [vmem:[%s1844_s4 + $0x10] sm:$0xff] }
 0xcdc   :  { %1518 = vtanh.f32 %v646_v47 }
 0xce6   :  { %v1519_v48 = vpop.eup %1518 }
 0xce7   :  { %649 = vrot.lane.b32.xlu0 %v1519_v48, %s1571_s18  ;;  %v977_v48 = vld [vmem:[%s1844_s4 + $0x18] sm:$0xff] }
 0xd59   :  { %v650_v49 = vpop.permute.xlu0 %649 }
 0xd5a   :  { %v652_v50 = vmul.f32 %v1517_v41, %v650_v49  ;;  %v1448_v49 = vpack.c.bf16 %v977_v48, %v976_v46 }
 0xd5c   :  { %654 = vrot.lane.b32.xlu1 %v652_v50, %s1572_s3 }
 0xdce   :  { %v655_v51 = vpop.permute.xlu1 %654 }
 0xdcf   :  { %1326 = vmatmul.mubr.msk.f32.vlgmr.msra.gmra.mrb[2].mxu0 %vm130_vm3, %v655_v51  ;;  %v1062_v51 = vld [vmem:[%s1846_s6] sm:$0xff] }
 0xdd0   :  { %1440 = vmatpush3.bf16.msra.mxu0 %v1637_v6  ;;  %1347 = vmatprep.mubr.msk.f32.mxu0 %vm1569_vm2, %v1570_v10 }
 0xdd1   :  { %1441 = vmatprep.subr.bf16.mxu0 %v1568_v8 }
 0xdd4   :  { %1443 = vmatpush3.bf16.msra.mxu0 %v1645_v9  ;;  %v740_v9 = vrot.slane %v646_v47, 6 }
 0xdd5   :  { %1450 = vmatprep.subr.bf16.mxu0 %v1568_v8 }
 0xea2   :  { %v724_v52 = vpop.f32.mrb[2].mxu0 }
 0xea3   :  { %v729_v53 = vrot.slane %v724_v52, 6  ;;  %v1327_v54 = vpop.f32.mrb[3].mxu0  ;;  %v1063_v52 = vld [vmem:[%s1846_s6 + $0x8] sm:$0xff] }
 0xea4   :  { %v1451_v54 = vpack.c.bf16 %v1063_v52, %v1062_v51 }
 0xea5   :  { %v731_v55 = vadd.f32 %v729_v53, %v1668_v13  ;;  %v1064_v53 = vld [vmem:[%s1846_s6 + $0x10] sm:$0xff] }
 0xea7   :  { %1520 = vtanh.f32 %v731_v55  ;;  %v1184_v57 = vmul.f32 -1.442695, %v731_v55  ;;  %v1065_v55 = vld [vmem:[%s1846_s6 + $0x18] sm:$0xff] }
 0xea9   :  { %1522 = vpow2.f32 %v1184_v57  ;;  %v1066_v57 = vld [vmem:[%s1846_s6 + $0x20] sm:$0xff] }
 0xeb1   :  { %v1521_v56 = vpop.eup %1520 }
 0xeb2   :  { %744 = vrot.lane.b32.xlu0 %v1521_v56, %s1571_s18  ;;  %v1454_v56 = vpack.c.bf16 %v1065_v55, %v1064_v53 }
 0xeb3   :  { %v1523_v6 = vpop.eup %1522 }
 0xeb4   :  { %v735_v58 = vadd.f32 1.0, %v1523_v6  ;;  %v1067_v6 = vld [vmem:[%s1846_s6 + $0x28] sm:$0xff] }
 0xeb6   :  { %1524 = vrcp.f32 %v735_v58 }
 0xec0   :  { %v1525_v59 = vpop.eup %1524 }
 0xec1   :  { %v742_v62 = vmul.f32 %v1525_v59, %v740_v9  ;;  %v1069_v9 = vld [vmem:[%s1846_s6 + $0x38] sm:$0xff] }
 0xf24   :  { %v745_v60 = vpop.permute.xlu0 %744 }
 0xf25   :  { %v747_v61 = vmul.f32 %v1525_v59, %v745_v60  ;;  %v1457_v60 = vpack.c.bf16 %v1067_v6, %v1066_v57 }
 0xf27   :  { %749 = vrot.lane.b32.xlu1 %v747_v61, %s1572_s3  ;;  %v1068_v61 = vld [vmem:[%s1846_s6 + $0x30] sm:$0xff] }
 0xf99   :  { %v750_v63 = vpop.permute.xlu1 %749 }
 0xf9a   :  { %v752_v0 = vadd.f32 %v750_v63, %v742_v62 }
 0xf9c   :  { %1526 = vtanh.f32 %v752_v0  ;;  %v847_v23 = vrot.slane %v752_v0, 6  ;;  %v1460_v0 = vpack.c.bf16 %v1069_v9, %v1068_v61 }
 0xfa6   :  { %v1527_v1 = vpop.eup %1526 }
 0xfa7   :  { %755 = vrot.lane.b32.xlu0 %v1527_v1, %s1571_s18  ;;  %v1070_v1 = vld [vmem:[%s1846_s6 + $0x40] sm:$0xff] }
0x1019   :  { %v756_v2 = vpop.permute.xlu0 %755 }
0x101a   :  { %v758_v3 = vmul.f32 %v1525_v59, %v756_v2  ;;  %v1071_v2 = vld [vmem:[%s1846_s6 + $0x48] sm:$0xff] }
0x101c   :  { %v760_v4 = vrot.slane %v758_v3, 2  ;;  %v1463_v3 = vpack.c.bf16 %v1071_v2, %v1070_v1 }
0x101e   :  { %761 = vrot.lane.b32.xlu1 %v760_v4, %s1572_s3  ;;  %v1072_v4 = vld [vmem:[%s1846_s6 + $0x50] sm:$0xff] }
0x1090   :  { %v762_v5 = vpop.permute.xlu1 %761 }
0x1091   :  { %1337 = vmatmul.mubr.msk.f32.vlgmr.msra.gmra.mrb[10].mxu1 %vm130_vm3, %v762_v5  ;;  %v1073_v5 = vld [vmem:[%s1846_s6 + $0x58] sm:$0xff] }
0x1092   :  { %1358 = vmatprep.mubr.msk.f32.mxu1 %vm1569_vm2, %v1570_v10 }
0x1164   :  { %v831_v7 = vpop.f32.mrb[10].mxu1 }
0x1165   :  { %v836_v11 = vrot.slane %v831_v7, 4  ;;  %v1338_v12 = vpop.f32.mrb[11].mxu1  ;;  %v1466_v7 = vpack.c.bf16 %v1073_v5, %v1072_v4 }
0x1166   :  { %v1075_v12 = vld [vmem:[%s1846_s6 + $0x68] sm:$0xff] }
0x1167   :  { %v838_v14 = vadd.f32 %v836_v11, %v1668_v13  ;;  %v1074_v11 = vld [vmem:[%s1846_s6 + $0x60] sm:$0xff] }
0x1169   :  { %1528 = vtanh.f32 %v838_v14  ;;  %v1186_v17 = vmul.f32 -1.442695, %v838_v14  ;;  %v1469_v14 = vpack.c.bf16 %v1075_v12, %v1074_v11 }
0x116b   :  { %1530 = vpow2.f32 %v1186_v17  ;;  %v1076_v17 = vld [vmem:[%s1846_s6 + $0x70] sm:$0xff] }
0x1173   :  { %v1529_v16 = vpop.eup %1528 }
0x1174   :  { %851 = vrot.lane.b32.xlu0 %v1529_v16, %s1571_s18 }
0x1175   :  { %v1531_v18 = vpop.eup %1530 }
0x1176   :  { %v842_v19 = vadd.f32 1.0, %v1531_v18  ;;  %v1077_v18 = vld [vmem:[%s1846_s6 + $0x78] sm:$0xff]  ;;  %s1544_s6 = scalar_lea.vmem %s1163_s14, 32 }
0x1177   :  { %p1545_p0 = scmp.ne.s32.totalorder %s1163_s14, %s1544_s6  ;;  %p1550_p2 = scmp.lt.s32.totalorder %s1544_s6, %s1544_s6 }
0x1178   :  { %1532 = vrcp.f32 %v842_v19  ;;  %v1472_v19 = vpack.c.bf16 %v1077_v18, %v1076_v17 }
0x1179   :  { %p1551_p3 = por %p1550_p2, %p1549_p1 }
0x117b   :  { %p1552_p4 = pnand %p1551_p3, %p1545_p0 }
0x1182   :  { %v1533_v20 = vpop.eup %1532 }
0x1183   :  { %v849_v24 = vmul.f32 %v1533_v20, %v847_v23 }
0x11e6   :  { %v852_v21 = vpop.permute.xlu0 %851 }
0x11e7   :  { %v854_v22 = vmul.f32 %v1533_v20, %v852_v21 }
0x11e9   :  { %856 = vrot.lane.b32.xlu1 %v854_v22, %s1572_s3 }
0x125b   :  { %v857_v25 = vpop.permute.xlu1 %856 }
0x125c   :  { %v859_v26 = vadd.f32 %v857_v25, %v849_v24  ;;  %v1191_v24 = vld [vmem:[%s1847_s7] ss:$0 sm:$0xff] }
0x125e   :  { %1534 = vtanh.f32 %v859_v26 }
0x1268   :  { %v1535_v27 = vpop.eup %1534 }
0x1269   :  { %862 = vrot.lane.b32.xlu0 %v1535_v27, %s1571_s18 }
0x12db   :  { %v863_v28 = vpop.permute.xlu0 %862 }
0x12dc   :  { %v865_v29 = vmul.f32 %v1533_v20, %v863_v28  ;;  %v1189_v20 = vld [vmem:[%s1845_s5] ss:$0 sm:$0xff] }
0x12de   :  { %v867_v15 = vrot.slane %v865_v29, 4 }
0x12e0   :  { %868 = vrot.lane.b32.xlu1 %v867_v15, %s1572_s3 }
0x1352   :  { %v869_v30 = vpop.permute.xlu1 %868 }
0x1353   :  { %1348 = vmatmul.mubr.msk.f32.vlgmr.msra.gmra.mrb[4].mxu0 %vm130_vm3, %v869_v30 }
0x1354   :  { %1393 = vmatprep.mubr.msk.f32.mxu0 %vm1569_vm2, %v1570_v10  ;;  %v954_v10 = vrot.slane %v859_v26, 6  ;;  %1452 = vmatpush3.bf16.msra.mxu0 %v1451_v54 }
0x1355   :  { %1453 = vmatprep.subr.bf16.mxu0 %v1568_v8 }
0x1358   :  { %1455 = vmatpush3.bf16.msra.mxu0 %v1454_v56 }
0x1359   :  { %1456 = vmatprep.subr.bf16.mxu0 %v1568_v8 }
0x135c   :  { %1458 = vmatpush3.bf16.msra.mxu0 %v1457_v60 }
0x135d   :  { %1459 = vmatprep.subr.bf16.mxu0 %v1568_v8 }
0x1360   :  { %1461 = vmatpush3.bf16.msra.mxu0 %v1460_v0 }
0x1361   :  { %1462 = vmatprep.subr.bf16.mxu0 %v1568_v8 }
0x1364   :  { %1464 = vmatpush3.bf16.msra.mxu0 %v1463_v3 }
0x1365   :  { %1465 = vmatprep.subr.bf16.mxu0 %v1568_v8 }
0x1368   :  { %1467 = vmatpush3.bf16.msra.mxu0 %v1466_v7 }
0x1369   :  { %1468 = vmatprep.subr.bf16.mxu0 %v1568_v8 }
0x136c   :  { %1470 = vmatpush3.bf16.msra.mxu0 %v1469_v14 }
0x136d   :  { %1471 = vmatprep.subr.bf16.mxu0 %v1568_v8 }
0x1370   :  { %1473 = vmatpush3.bf16.msra.mxu0 %v1472_v19 }
0x1426   :  { %v938_v31 = vpop.f32.mrb[4].mxu0 }
0x1427   :  { %v943_v32 = vrot.slane %v938_v31, 2  ;;  %v1349_v33 = vpop.f32.mrb[5].mxu0 }
0x1429   :  { %v945_v34 = vadd.f32 %v943_v32, %v1668_v13  ;;  %v974_v13 = vld [vmem:[%s1844_s4] sm:$0xff] }
0x142a   :  { %v1445_v47 = vpack.c.bf16 %v975_v45, %v974_v13 }
0x142b   :  { %1536 = vtanh.f32 %v945_v34  ;;  %v1188_v36 = vmul.f32 -1.442695, %v945_v34 }
0x142c   :  { %1446 = vmatpush3.bf16.msra.mxu1 %v1445_v47 }
0x142d   :  { %1538 = vpow2.f32 %v1188_v36  ;;  %1447 = vmatprep.subr.bf16.mxu1 %v1568_v8 }
0x1430   :  { %1449 = vmatpush3.bf16.msra.mxu1 %v1448_v49 }
0x1435   :  { %v1537_v35 = vpop.eup %1536 }
0x1436   :  { %958 = vrot.lane.b32.xlu0 %v1537_v35, %s1571_s18 }
0x1437   :  { %v1539_v37 = vpop.eup %1538 }
0x1438   :  { %v949_v38 = vadd.f32 1.0, %v1539_v37 }
0x143a   :  { %1540 = vrcp.f32 %v949_v38 }
0x1444   :  { %v1541_v39 = vpop.eup %1540 }
0x1445   :  { %v956_v42 = vmul.f32 %v1541_v39, %v954_v10 }
0x14a8   :  { %v959_v40 = vpop.permute.xlu0 %958 }
0x14a9   :  { %v961_v41 = vmul.f32 %v1541_v39, %v959_v40 }
0x14ab   :  { %963 = vrot.lane.b32.xlu1 %v961_v41, %s1572_s3 }
0x151d   :  { %v964_v43 = vpop.permute.xlu1 %963 }
0x151e   :  { %v966_v44 = vadd.f32 %v964_v43, %v956_v42 }
0x1520   :  { %1542 = vtanh.f32 %v966_v44 }
0x152a   :  { %v1543_v50 = vpop.eup %1542 }
0x152b   :  { %969 = vrot.lane.b32.xlu0 %v1543_v50, %s1571_s18 }
0x159d   :  { %v970_v58 = vpop.permute.xlu0 %969 }
0x159e   :  { %v972_v59 = vmul.f32 %v1541_v39, %v970_v58 }
0x15a0   :  { %v973_v62 = vmax.f32 %v972_v59, 0.0 }
0x15a2   :  { %v986_v63 = vrot.slane %v973_v62, 6 }
0x15a4   :  { %987 = vrot.lane.b32.xlu1 %v986_v63, %s1572_s3 }
0x1616   :  { %v988_v16 = vpop.permute.xlu1 %987 }
0x1617   :  { %1359 = vmatmul.mubr.msk.f32.vlgmr.msra.gmra.mrb[12].mxu1 %vm130_vm3, %v988_v16 }
0x16ea   :  { %v1057_v21 = vpop.f32.mrb[12].mxu1 }
0x16eb   :  { %v1058_v22 = vadd.f32 %v1189_v20, %v1057_v21  ;;  %v1360_v8 = vpop.f32.mrb[13].mxu1 }
0x16ed   :  { %v1061_v23 = vmax.f32 %v1058_v22, 0.0 }
0x16ef   :  { %1394 = vmatmul.mubr.f32.vlgmr.msra.gmra.mrb[6].mxu0 %v1061_v23 }
0x17c2   :  { %v1151_v25 = vpop.f32.mrb[6].mxu0 }
0x17c3   :  { %v1152_v26 = vadd.f32 %v1191_v24, %v1151_v25  ;;  %v1395_v27 = vpop.f32.mrb[7].mxu0 }
0x17c5   :  { %1155 = vst [vmem:[#allocation2] sm:$0x3] %v1152_v26 }
0x17c6   :  { %1555 = shalt.err (!%p1552_p4)
}
0x17c7   :  { %s1556_s15 = scalar_lea.hbm %s1848_s8, 32 }
0x17c8   :  { %p1557_p5 = scmp.ne.s32.totalorder %s1848_s8, %s1556_s15  ;;  %p1560_p6 = scmp.lt.u32.totalorder %s1556_s15, %s1848_s8 }
0x17ca   :  { %p1562_p7 = pnand %p1560_p6, %p1557_p5 }
0x17cc   :  { %1565 = shalt.err (!%p1562_p7)
}
0x17cd   :  { %1165 = dma.vmem_to_hbm [thread:$0]  %s1163_s14, 32, %s1848_s8, [#allocation3]  }
0x17ce   :  { %1566 = dma.done.wait [#allocation3], 32  }
0x17cf   :  { %1567 = vsyncadd [#allocation3], 4294967264 }
0x17d0   :  { %1169 = vsyncpa [#allocation3], 1 }

</bundles_post_ra>
